<compile_context>
chip_gen: v7x
topology: tpu7x:2x2x1
jax: 0.10.0
libtpu: 0.0.40
codegen_flags: <defaults>
</compile_context>

<pallas_src>
import math
import functools

import jax
import jax.numpy as jnp
import numpy as np
from jax import lax
from jax.experimental import pallas as pl
from jax.experimental.pallas import tpu as pltpu


def _round_up(x, m):
    return ((x + m - 1) // m) * m


# ----------------------------- Linear (tiled matmul + bias) -------------------
def _linear_kernel(x_ref, wt_ref, b_ref, o_ref, acc_ref):
    # grid = (M_tiles, N_tiles, K_tiles); K is the reduction ("arbitrary", last) axis.
    @pl.when(pl.program_id(2) == 0)
    def _():
        acc_ref[...] = jnp.zeros_like(acc_ref)

    # bf16 feeds the MXU; accumulation stays f32.
    acc_ref[...] += jnp.dot(x_ref[...].astype(jnp.bfloat16), wt_ref[...],
                            preferred_element_type=jnp.float32)

    @pl.when(pl.program_id(2) == pl.num_programs(2) - 1)
    def _():
        o_ref[...] = (acc_ref[...] + b_ref[...]).astype(o_ref.dtype)


def pallas_linear(x, wt, b, out_dtype=None, *, tile_m=512, tile_n=512, tile_k=512):
    """y = x @ wt + b.

    x : (M, Din) f32 or bf16 activations.
    wt: (Din, Dout) weight, already transposed to matmul layout and cast to bf16 at init.
    b : (Dout,) f32 bias.
    """
    M, Din = x.shape
    Dout = wt.shape[1]
    out_dtype = out_dtype if out_dtype is not None else x.dtype

    # MXU-friendly tiles; small dims fall back to the full extent (keeps the
    # "block last dims divisible by (8,128) or equal full dim" rule satisfied).
    if M <= tile_m:
        Mp = tm = _round_up(M, 8)
    else:
        Mp, tm = _round_up(M, tile_m), tile_m
    if Din <= tile_k:
        Kp = tk = Din
    else:
        Kp, tk = _round_up(Din, tile_k), tile_k
    if Dout <= tile_n:
        Np = tn = Dout
    else:
        Np, tn = _round_up(Dout, tile_n), tile_n

    x_p = x if (Mp == M and Kp == Din) else jnp.pad(x, ((0, Mp - M), (0, Kp - Din)))
    wt_p = wt if (Kp == Din and Np == Dout) else jnp.pad(wt, ((0, Kp - Din), (0, Np - Dout)))
    b_p = b.reshape(1, Dout).astype(jnp.float32)
    if Np != Dout:
        b_p = jnp.pad(b_p, ((0, 0), (0, Np - Dout)))

    out = pl.pallas_call(
        _linear_kernel,
        out_shape=jax.ShapeDtypeStruct((Mp, Np), out_dtype),
        grid_spec=pltpu.PrefetchScalarGridSpec(
            num_scalar_prefetch=0,
            grid=(Mp // tm, Np // tn, Kp // tk),
            in_specs=[
                pl.BlockSpec((tm, tk), lambda i, j, k: (i, k)),
                pl.BlockSpec((tk, tn), lambda i, j, k: (k, j)),
                # Bias block index is independent of k -> Pallas skips the re-DMA
                # across the reduction axis.
                pl.BlockSpec((1, tn), lambda i, j, k: (0, j)),
            ],
            out_specs=pl.BlockSpec((tm, tn), lambda i, j, k: (i, j)),
            scratch_shapes=[pltpu.VMEM((tm, tn), jnp.float32)],
        ),
        compiler_params=pltpu.CompilerParams(
            dimension_semantics=("parallel", "parallel", "arbitrary")),
    )(x_p, wt_p, b_p)

    if Mp != M or Np != Dout:
        out = out[:M, :Dout]
    return out


# --------------------------- Attention kernel --------------------------------
def _mha_attn_kernel(*refs, n_heads, d_k, has_mask):
    if has_mask:
        q_ref, k_ref, v_ref, mask_ref, o_ref, acc_ref = refs
    else:
        q_ref, k_ref, v_ref, o_ref, acc_ref = refs
        mask_ref = None

    q = q_ref[0]                              # (tq, D) bf16; 1/sqrt(d_k) folded into W_q
    k = k_ref[0]                              # (Sk, D) bf16
    v = v_ref[0]                              # (Sk, D) bf16

    if has_mask:
        # One compare+select for all heads; heads only pay an add.
        mi = mask_ref[0].astype(jnp.int32)
        bias = jnp.where(mi == 0, jnp.float32(-1000000000.0), jnp.float32(0.0))

    for head in range(n_heads):               # static loop, heads sliced on the lane dim
        lo = head * d_k
        qh = q[:, lo:lo + d_k]                # (tq, d_k)
        kh = k[:, lo:lo + d_k]                # (Sk, d_k)
        vh = v[:, lo:lo + d_k]                # (Sk, d_k)

        # Contract last dims directly (no k.T materialization); f32 scores.
        s = lax.dot_general(qh, kh, (((1,), (1,)), ((), ())),
                            preferred_element_type=jnp.float32)     # (tq, Sk) f32
        if has_mask:
            s = s + bias

        m = jnp.max(s, axis=-1, keepdims=True)
        e = jnp.exp(s - m)
        l = jnp.sum(e, axis=-1, keepdims=True)
        p = e * pl.reciprocal(l)                                    # exact (approx=False)
        acc_ref[:, lo:lo + d_k] = jnp.dot(p.astype(v.dtype), vh,
                                          preferred_element_type=jnp.float32)

    # Single lane-dense store of the full (tq, D) slab (heads merged in the scratch).
    o_ref[0] = acc_ref[...].astype(o_ref.dtype)


def pallas_mha_attention(q, k, v, n_heads, mask=None, *, tile_q=256):
    """q: (B, Sq, D); k, v: (B, Sk, D); mask broadcastable to (B, Sq, Sk) or None.

    Head split/merge happens inside the kernel -> no XLA-side transposes.
    Grid is (batch, Sq tiles), both parallel. Output is bf16.
    """
    B, Sq, D = q.shape
    Sk = k.shape[1]
    d_k = D // n_heads

    if Sq <= tile_q:
        Sq_p = tq = _round_up(Sq, 8)
    else:
        Sq_p, tq = _round_up(Sq, tile_q), tile_q
    if Sq_p != Sq:
        q = jnp.pad(q, ((0, 0), (0, Sq_p - Sq), (0, 0)))

    in_specs = [
        pl.BlockSpec((1, tq, D), lambda b, i: (b, i, 0)),
        pl.BlockSpec((1, Sk, D), lambda b, i: (b, 0, 0)),   # same block across i -> no re-DMA
        pl.BlockSpec((1, Sk, D), lambda b, i: (b, 0, 0)),
    ]
    args = [q, k, v]

    has_mask = mask is not None
    if has_mask:
        mask_arr = jnp.asarray(mask)
        if mask_arr.ndim == 2:
            mask_arr = mask_arr[None]
        Bm = B if mask_arr.shape[0] == B else 1
        # Natural batch dim (no B-times duplication in HBM), int8 (4x less DMA than i32).
        mask_arr = jnp.broadcast_to((mask_arr != 0), (Bm, Sq, Sk)).astype(jnp.int8)
        if Sq_p != Sq:
            mask_arr = jnp.pad(mask_arr, ((0, 0), (0, Sq_p - Sq), (0, 0)),
                               constant_values=1)
        if Bm == 1:
            in_specs.append(pl.BlockSpec((1, tq, Sk), lambda b, i: (0, i, 0)))
        else:
            in_specs.append(pl.BlockSpec((1, tq, Sk), lambda b, i: (b, i, 0)))
        args.append(mask_arr)

    kern = functools.partial(_mha_attn_kernel, n_heads=n_heads, d_k=d_k, has_mask=has_mask)
    # TODO(synk): flash-style Sk streaming (online softmax) for long sequences / v7x.
    out = pl.pallas_call(
        kern,
        out_shape=jax.ShapeDtypeStruct((B, Sq_p, D), jnp.bfloat16),
        grid_spec=pltpu.PrefetchScalarGridSpec(
            num_scalar_prefetch=0,
            grid=(B, Sq_p // tq),
            in_specs=in_specs,
            out_specs=pl.BlockSpec((1, tq, D), lambda b, i: (b, i, 0)),
            scratch_shapes=[pltpu.VMEM((tq, D), jnp.float32)],
        ),
        compiler_params=pltpu.CompilerParams(
            dimension_semantics=("parallel", "parallel"),
            vmem_limit_bytes=64 * 1024 * 1024,   # v5e default scoped 16 MiB is too tight
        ),
    )(*args)

    if Sq_p != Sq:
        out = out[:, :Sq, :]
    return out


# ------------------------- MultiHeadedAttention ------------------------------
def init_mha_params(key, h, d_model):
    assert d_model % h == 0
    d_k = d_model // h
    ks = jax.random.split(key, 8)
    scale = 1.0 / math.sqrt(d_model)
    ws = [scale * jax.random.normal(ks[i], (d_model, d_model), jnp.float32) for i in range(4)]
    bs = [scale * jax.random.normal(ks[4 + i], (d_model,), jnp.float32) for i in range(4)]

    inv_sqrt_dk = 1.0 / math.sqrt(d_k)
    # Pre-transposed (Din, Dout) bf16 weights for the Pallas path. The 1/sqrt(d_k)
    # attention scale is folded into the Q projection (weights AND bias) at init.
    wt_q = (ws[0].T * inv_sqrt_dk).astype(jnp.bfloat16)
    wt_k = ws[1].T.astype(jnp.bfloat16)
    wt_v = ws[2].T.astype(jnp.bfloat16)
    wt_o = ws[3].T.astype(jnp.bfloat16)
    b_q = bs[0] * inv_sqrt_dk

    return {
        "h": h, "d_model": d_model, "d_k": d_k,
        "w": ws, "b": bs,                                        # f32 torch layout (reference)
        "wt_q": wt_q, "wt_k": wt_k, "wt_v": wt_v, "wt_o": wt_o,
        "b_q": b_q, "b_k": bs[1], "b_v": bs[2], "b_o": bs[3],
        "wt_qkv": jnp.concatenate([wt_q, wt_k, wt_v], axis=1),   # (D, 3D) bf16 fused
        "b_qkv": jnp.concatenate([b_q, bs[1], bs[2]], axis=0),   # (3D,)
        "wt_kv": jnp.concatenate([wt_k, wt_v], axis=1),          # (D, 2D) bf16 fused
        "b_kv": jnp.concatenate([bs[1], bs[2]], axis=0),         # (2D,)
    }


def multi_headed_attention(params, query, key, value, mask=None):
    """query: (B, Sq, d_model); key/value: (B, Sk, d_model). Returns (B, Sq, d_model)."""
    h = params["h"]
    D = params["d_model"]
    B, Sq, _ = query.shape
    Sk = key.shape[1]

    if (query is key) and (key is value):
        # Self-attention: fused QKV projection -> x read from HBM once, 1 pallas_call.
        qkv = pallas_linear(query.reshape(B * Sq, D), params["wt_qkv"], params["b_qkv"],
                            out_dtype=jnp.bfloat16)
        q = qkv[:, :D].reshape(B, Sq, D)
        k = qkv[:, D:2 * D].reshape(B, Sq, D)
        v = qkv[:, 2 * D:].reshape(B, Sq, D)
    else:
        q = pallas_linear(query.reshape(B * Sq, D), params["wt_q"], params["b_q"],
                          out_dtype=jnp.bfloat16).reshape(B, Sq, D)
        if key is value:
            kv = pallas_linear(key.reshape(B * Sk, D), params["wt_kv"], params["b_kv"],
                               out_dtype=jnp.bfloat16)
            k = kv[:, :D].reshape(B, Sk, D)
            v = kv[:, D:].reshape(B, Sk, D)
        else:
            k = pallas_linear(key.reshape(B * Sk, D), params["wt_k"], params["b_k"],
                              out_dtype=jnp.bfloat16).reshape(B, Sk, D)
            v = pallas_linear(value.reshape(B * Sk, D), params["wt_v"], params["b_v"],
                              out_dtype=jnp.bfloat16).reshape(B, Sk, D)

    # Dropout(p=0.1) on p_attn: identity in eval/inference mode.
    x = pallas_mha_attention(q, k, v, h, mask=mask)               # (B, Sq, D) bf16
    out = pallas_linear(x.reshape(B * Sq, D), params["wt_o"], params["b_o"],
                        out_dtype=query.dtype)
    return out.reshape(B, Sq, D)


# ------------------------------ Reference ------------------------------------
def reference_mha(params, query, key, value, mask=None):
    h = params["h"]
    B, Sq, D = query.shape
    Sk = key.shape[1]
    d_k = D // h

    def lin(idx, x):
        return x @ params["w"][idx].T + params["b"][idx]

    q = lin(0, query).reshape(B, Sq, h, d_k).transpose(0, 2, 1, 3)
    k = lin(1, key).reshape(B, Sk, h, d_k).transpose(0, 2, 1, 3)
    v = lin(2, value).reshape(B, Sk, h, d_k).transpose(0, 2, 1, 3)
    scores = jnp.einsum("bhqd,bhkd->bhqk", q, k) / math.sqrt(d_k)
    if mask is not None:
        m = jnp.broadcast_to(mask, (B, Sq, Sk))[:, None, :, :]
        scores = jnp.where(m == 0, -1000000000.0, scores)
    p = jax.nn.softmax(scores, axis=-1)
    o = jnp.einsum("bhqk,bhkd->bhqd", p, v)
    x = o.transpose(0, 2, 1, 3).reshape(B, Sq, D)
    return x @ params["w"][3].T + params["b"][3]


# --------------------------------- Main ---------------------------------------
if __name__ == "__main__":
    B, S, d_model, h = 2, 8, 32, 4
    root = jax.random.PRNGKey(0)
    kp, kx, kk, kv = jax.random.split(root, 4)

    params = init_mha_params(kp, h, d_model)
    x_in = jax.random.normal(kx, (B, S, d_model), jnp.float32)
    key_in = jax.random.normal(kk, (B, S, d_model), jnp.float32)
    val_in = jax.random.normal(kv, (B, S, d_model), jnp.float32)

    # Tolerance reflects bf16 activations/weights on the MXU (accumulation is f32,
    # softmax math is f32, reciprocal is exact); the reference is pure f32.
    tol = dict(rtol=5e-2, atol=5e-2)

    # 1) Self-attention, unmasked (exercises the fused QKV projection path).
    out = jax.block_until_ready(multi_headed_attention(params, x_in, x_in, x_in, mask=None))
    ref = reference_mha(params, x_in, x_in, x_in, mask=None)
    np.testing.assert_allclose(np.asarray(out), np.asarray(ref), **tol)

    # 2) Self-attention with a causal mask (masked_fill(mask == 0, -1e9) semantics),
    #    mask kept at its natural (1, S, S) shape and broadcast over batch in-kernel.
    causal = jnp.tril(jnp.ones((S, S), jnp.int32))[None]
    out_m = jax.block_until_ready(multi_headed_attention(params, x_in, x_in, x_in, mask=causal))
    ref_m = reference_mha(params, x_in, x_in, x_in, mask=causal)
    np.testing.assert_allclose(np.asarray(out_m), np.asarray(ref_m), **tol)

    # 3) Cross-attention (distinct q / k / v tensors -> separate projection path).
    out_c = jax.block_until_ready(multi_headed_attention(params, x_in, key_in, val_in, mask=None))
    ref_c = reference_mha(params, x_in, key_in, val_in, mask=None)
    np.testing.assert_allclose(np.asarray(out_c), np.asarray(ref_c), **tol)

    print("KERNEL_OK")
</pallas_src>

<mosaic_0001>
module attributes {stable_mosaic.version = 11 : i64} {
  func.func @_linear_kernel(%arg0: i32, %arg1: i32, %arg2: i32, %arg3: memref<16x32xf32, #tpu.memory_space<vmem>>, %arg4: memref<32x96xbf16, #tpu.memory_space<vmem>>, %arg5: memref<1x96xf32, #tpu.memory_space<vmem>>, %arg6: memref<16x96xbf16, #tpu.memory_space<vmem>>, %arg7: memref<16x96xf32, #tpu.memory_space<vmem>>) attributes {dimension_semantics = [#tpu.dimension_semantics<parallel>, #tpu.dimension_semantics<parallel>, #tpu.dimension_semantics<arbitrary>], iteration_bounds = array<i64: 1, 1, 1>, scalar_prefetch = 0 : i64, scratch_operands = 1 : i64, tpu.core_type = #tpu.core_type<tc>, window_params = [{transform_indices = @transform_0, window_bounds = array<i64: 16, 32>}, {transform_indices = @transform_1, window_bounds = array<i64: 32, 96>}, {transform_indices = @transform_2, window_bounds = array<i64: 1, 96>}, {transform_indices = @transform_3, window_bounds = array<i64: 16, 96>}]} {
    %c0_i32 = arith.constant 0 : i32
    %0 = arith.cmpi eq, %arg2, %c0_i32 : i32
    %1 = arith.extui %0 : i1 to i32
    %c0_i32_0 = arith.constant 0 : i32
    %2 = arith.cmpi ne, %1, %c0_i32_0 : i32
    scf.if %2 {
      %cst_10 = arith.constant 0.000000e+00 : f32
      %13 = vector.broadcast %cst_10 : f32 to vector<16x96xf32>
      %c0_11 = arith.constant 0 : index
      %c0_12 = arith.constant 0 : index
      %14 = vector.load %arg7[%c0_11, %c0_12] : memref<16x96xf32, #tpu.memory_space<vmem>>, vector<16x96xf32>
      tpu.vector_store %arg7[%c0_11, %c0_12], %13 {strides = array<i32>} : memref<16x96xf32, #tpu.memory_space<vmem>>, vector<16x96xf32>,
    } else {
    }
    %c0 = arith.constant 0 : index
    %c0_1 = arith.constant 0 : index
    %3 = vector.load %arg7[%c0, %c0_1] : memref<16x96xf32, #tpu.memory_space<vmem>>, vector<16x96xf32>
    %c0_2 = arith.constant 0 : index
    %c0_3 = arith.constant 0 : index
    %4 = vector.load %arg3[%c0_2, %c0_3] : memref<16x32xf32, #tpu.memory_space<vmem>>, vector<16x32xf32>
    %5 = arith.truncf %4 : vector<16x32xf32> to vector<16x32xbf16>
    %c0_4 = arith.constant 0 : index
    %c0_5 = arith.constant 0 : index
    %6 = vector.load %arg4[%c0_4, %c0_5] : memref<32x96xbf16, #tpu.memory_space<vmem>>, vector<32x96xbf16>
    %cst = arith.constant dense<0.000000e+00> : vector<16x96xf32>
    %7 = tpu.matmul %5, %6, %cst {dimension_numbers = #tpu.dot_dimension_numbers<[1], [0], [0], [1], [0, 0, 1, 1], [], []>} : vector<16x32xbf16>, vector<32x96xbf16>, vector<16x96xf32> -> vector<16x96xf32>
    %8 = arith.addf %3, %7 : vector<16x96xf32>
    %c0_6 = arith.constant 0 : index
    %c0_7 = arith.constant 0 : index
    %9 = vector.load %arg7[%c0_6, %c0_7] : memref<16x96xf32, #tpu.memory_space<vmem>>, vector<16x96xf32>
    tpu.vector_store %arg7[%c0_6, %c0_7], %8 {strides = array<i32>} : memref<16x96xf32, #tpu.memory_space<vmem>>, vector<16x96xf32>,
    %c0_i32_8 = arith.constant 0 : i32
    %10 = arith.cmpi eq, %arg2, %c0_i32_8 : i32
    %11 = arith.extui %10 : i1 to i32
    %c0_i32_9 = arith.constant 0 : i32
    %12 = arith.cmpi ne, %11, %c0_i32_9 : i32
    scf.if %12 {
      %c0_10 = arith.constant 0 : index
      %c0_11 = arith.constant 0 : index
      %13 = vector.load %arg7[%c0_10, %c0_11] : memref<16x96xf32, #tpu.memory_space<vmem>>, vector<16x96xf32>
      %c0_12 = arith.constant 0 : index
      %c0_13 = arith.constant 0 : index
      %14 = vector.load %arg5[%c0_12, %c0_13] : memref<1x96xf32, #tpu.memory_space<vmem>>, vector<1x96xf32>
      %15 = vector.broadcast %14 : vector<1x96xf32> to vector<16x96xf32>
      %16 = arith.addf %13, %15 : vector<16x96xf32>
      %17 = arith.truncf %16 : vector<16x96xf32> to vector<16x96xbf16>
      %c0_14 = arith.constant 0 : index
      %c0_15 = arith.constant 0 : index
      %18 = vector.load %arg6[%c0_14, %c0_15] : memref<16x96xbf16, #tpu.memory_space<vmem>>, vector<16x96xbf16>
      tpu.vector_store %arg6[%c0_14, %c0_15], %17 {strides = array<i32>} : memref<16x96xbf16, #tpu.memory_space<vmem>>, vector<16x96xbf16>,
    } else {
    }
    return
  }
  func.func @transform_0(%arg0: i32, %arg1: i32, %arg2: i32) -> (i32, i32) {
    %c0_i32 = arith.constant 0 : i32
    return %arg0, %arg2 : i32, i32
  }
  func.func @transform_1(%arg0: i32, %arg1: i32, %arg2: i32) -> (i32, i32) {
    %c0_i32 = arith.constant 0 : i32
    return %arg2, %arg1 : i32, i32
  }
  func.func @transform_2(%arg0: i32, %arg1: i32, %arg2: i32) -> (i32, i32) {
    %c0_i32 = arith.constant 0 : i32
    %c0_i32_0 = arith.constant 0 : i32
    return %c0_i32, %arg1 : i32, i32
  }
  func.func @transform_3(%arg0: i32, %arg1: i32, %arg2: i32) -> (i32, i32) {
    %c0_i32 = arith.constant 0 : i32
    return %arg0, %arg1 : i32, i32
  }
}

</mosaic_0001>

<bundles_post_ra>
// kernel: tpu_custom_call.1
= control target key start
LH: loop header
LB: loop body
LE: loop exit
PB: predicated region body
PF: predicated region fallthrough
CT: control target
= control target key end

     0   :  { %8 = vsyncpa [#allocation4], 0  ;;  %s345_s0 = inlined_call_operand.hbm [shape: f32[16,32], index: 0, kind: input, shape index: {}]   ;;  %s346_s1 = inlined_call_operand.hbm [shape: bf16[32,96], index: 1, kind: input, shape index: {}]   ;;  %s347_s2 = inlined_call_operand.vmem [shape: f32[1,96], index: 2, kind: input, shape index: {}]   ;;  %s348_s3 = inlined_call_operand.hbm [shape: bf16[16,96], index: 3, kind: output, shape index: {}]  }
   0x1   :  { %9 = vsyncpa [#allocation7], 0 }
   0x2   :  { %10 = vsyncpa [#allocation5], 0  ;;  %s267_s12 = smov [#allocation3]   ;;  %s195_s16 = scalar_lea.hbm %s345_s0, 256 }
   0x3   :  { %s16_s13 = sshll.u32 %s267_s12, 4  ;;  %p196_p0 = scmp.ne.s32.totalorder %s345_s0, %s195_s16  ;;  %s17_s13 = int_to_ptr.vmem [resolvable:$true] %s16_s13 }
   0x4   :  { %p199_p1 = scmp.lt.u32.totalorder %s195_s16, %s345_s0 }
   0x6   :  { %p201_p2 = pnand %p199_p1, %p196_p0 }
   0x8   :  { %204 = shalt.err (!%p201_p2)
}
   0x9   :  { %s205_s21 = scalar_lea.vmem %s17_s13, 256  ;;  %p210_p4 = scmp.lt.s32.totalorder %s17_s13, %s17_s13 }
   0xa   :  { %p206_p3 = scmp.ne.s32.totalorder %s17_s13, %s205_s21  ;;  %p211_p5 = scmp.lt.s32.totalorder %s205_s21, %s205_s21 }
   0xc   :  { %p212_p6 = por %p211_p5, %p210_p4 }
   0xe   :  { %p213_p7 = pnand %p212_p6, %p206_p3 }
  0x10   :  { %216 = shalt.err (!%p213_p7)
}
  0x11   :  { %s268_s22 = smov 128   ;;  %s269_s23 = smov 8  }
  0x12   :  { %22 = dma.hbm_to_vmem [thread:$0]  %s345_s0, 256, %s17_s13, [#allocation4], %s268_s22, %s268_s22, %s269_s23  }
  0x13   :  { %s270_s26 = smov [#allocation6]   ;;  %s217_s30 = scalar_lea.hbm %s346_s1, 256 }
  0x14   :  { %s28_s27 = sshll.u32 %s270_s26, 4  ;;  %p218_p8 = scmp.ne.s32.totalorder %s346_s1, %s217_s30  ;;  %s29_s27 = int_to_ptr.vmem [resolvable:$true] %s28_s27 }
  0x15   :  { %p221_p9 = scmp.lt.u32.totalorder %s217_s30, %s346_s1 }
  0x17   :  { %p223_p10 = pnand %p221_p9, %p218_p8 }
  0x19   :  { %226 = shalt.err (!%p223_p10)
}
  0x1a   :  { %s227_s8 = scalar_lea.vmem %s29_s27, 256  ;;  %p232_p12 = scmp.lt.s32.totalorder %s29_s27, %s29_s27 }
  0x1b   :  { %p228_p11 = scmp.ne.s32.totalorder %s29_s27, %s227_s8  ;;  %p233_p13 = scmp.lt.s32.totalorder %s227_s8, %s227_s8 }
  0x1d   :  { %p234_p0 = por %p233_p13, %p232_p12 }
  0x1f   :  { %p235_p1 = pnand %p234_p0, %p228_p11 }
  0x21   :  { %238 = shalt.err (!%p235_p1)
}
  0x22   :  { %s271_s0 = smov 64   ;;  %s272_s9 = smov 4  }
  0x23   :  { %34 = dma.hbm_to_vmem [thread:$0]  %s346_s1, 256, %s29_s27, [#allocation7], %s271_s0, %s271_s0, %s272_s9  }
  0x24   :  { %261 = dma.done.wait [#allocation4], 256  }
  0x25   :  { %262 = vsyncadd [#allocation4], 4294967040 }
  0x26   :  { %263 = dma.done.wait [#allocation7], 256  }
  0x27   :  { %264 = vsyncadd [#allocation7], 4294967040  ;;  %vm48_vm0 = vcmask 785408   ;;  %v273_v0 = vmov 0.0   ;;  %vm274_vm1 = vmmov 0   ;;  %v193_v1 = vld [vmem:[#allocation6] sm:$0xff]  }
  0x28   :  { %49 = vst.msk [vmem:[#allocation2] sm:$0xff] %vm48_vm0, %v273_v0  ;;  %50 = vst.msk [vmem:[#allocation2 + $0x8] sm:$0xff] %vm48_vm0, %v273_v0  ;;  %176 = vmatprep.subr.bf16.mxu0 %v273_v0  ;;  %180 = vmatprep.mubr.msk.bf16.mxu0 %vm274_vm1, %v273_v0  ;;  %v194_v2 = vld [vmem:[#allocation6 + $0x8] sm:$0xff]   ;;  %v53_v3 = vld [vmem:[#allocation3] sm:$0xff]  ;;  %vm72_vm2 = vcmask 261120   ;;  %vm144_vm3 = vcmask 781312  }
  0x29   :  { %177 = vmatpush3.bf16.msra.mxu0 %v193_v1  ;;  %v54_v4 = vld [vmem:[#allocation3 + $0x8] sm:$0xff]  ;;  %v168_v14 = vld [vmem:[%s347_s2] ss:$0 sm:$0xff]  ;;  %s275_s13 = smov [#allocation8]  }
  0x2a   :  { %178 = vmatprep.subr.bf16.mxu0 %v273_v0  ;;  %v55_v5 = vpack.c.bf16 %v54_v4, %v53_v3  ;;  %s152_s14 = sshll.u32 %s275_s13, 4  ;;  %s153_s14 = int_to_ptr.vmem [resolvable:$true] %s152_s14 }
  0x2b   :  { %s239_s15 = scalar_lea.vmem %s153_s14, 128  ;;  %p244_p3 = scmp.lt.s32.totalorder %s153_s14, %s153_s14 }
  0x2c   :  { %p240_p2 = scmp.ne.s32.totalorder %s153_s14, %s239_s15  ;;  %p245_p4 = scmp.lt.s32.totalorder %s239_s15, %s239_s15 }
  0x2d   :  { %179 = vmatpush3.bf16.msra.mxu0 %v194_v2 }
  0x2e   :  { %p246_p5 = por %p245_p4, %p244_p3 }
  0x2f   :  { %v51_v6 = vld [vmem:[#allocation2] sm:$0xff]  ;;  %v52_v8 = vld [vmem:[#allocation2 + $0x8] sm:$0xff] }
  0x30   :  { %181 = vmatmul.mubr.msk.bf16.vlgmr.msra.gmra.mrb[0].mxu0 %vm72_vm2, %v55_v5  ;;  %p247_p6 = pnand %p246_p5, %p240_p2 }
 0x103   :  { %v110_v7 = vpop.f32.mrb[0].mxu0 }
 0x104   :  { %v117_v9 = vadd.f32 %v110_v7, %v51_v6  ;;  %v182_v10 = vpop.f32.mrb[1].mxu0 }
 0x105   :  { %v113_v11 = vpop.f32.mrb[2].mxu0 }
 0x106   :  { %120 = vst.msk [vmem:[#allocation2] sm:$0xff] %vm48_vm0, %v117_v9  ;;  %v118_v12 = vadd.f32 %v113_v11, %v52_v8  ;;  %v183_v13 = vpop.f32.mrb[3].mxu0 }
 0x108   :  { %121 = vst.msk [vmem:[#allocation2 + $0x8] sm:$0xff] %vm48_vm0, %v118_v12 }
 0x10d   :  { %v125_v15 = vld [vmem:[#allocation2] sm:$0xff] }
 0x10e   :  { %v134_v16 = vadd.f32 %v168_v14, %v125_v15 }
 0x10f   :  { %v126_v17 = vld [vmem:[#allocation2 + $0x8] sm:$0xff] }
 0x110   :  { %v135_v18 = vadd.f32 %v168_v14, %v126_v17  ;;  %v171_v19 = vpack.c.bf16 %v134_v16, %v134_v16 }
 0x112   :  { %v172_v20 = vpack.c.bf16 %v135_v18, %v135_v18  ;;  %145 = vst.msk [vmem:[#allocation8] sm:$0xf] %vm144_vm3, %v171_v19 }
 0x114   :  { %146 = vst.msk [vmem:[#allocation8 + $0x4] sm:$0xf] %vm144_vm3, %v172_v20 }
 0x115   :  { %250 = shalt.err (!%p247_p6)
}
 0x116   :  { %s251_s17 = scalar_lea.hbm %s348_s3, 128 }
 0x117   :  { %p252_p7 = scmp.ne.s32.totalorder %s348_s3, %s251_s17  ;;  %p255_p8 = scmp.lt.u32.totalorder %s251_s17, %s348_s3 }
 0x119   :  { %p257_p9 = pnand %p255_p8, %p252_p7 }
 0x11b   :  { %260 = shalt.err (!%p257_p9)
}
 0x11c   :  { %158 = dma.vmem_to_hbm [thread:$0]  %s153_s14, 128, %s348_s3, [#allocation5], %s271_s0, %s271_s0, %s272_s9  }
 0x11d   :  { %265 = dma.done.wait [#allocation5], 128  }
 0x11e   :  { %266 = vsyncadd [#allocation5], 4294967168 }
 0x11f   :  { %162 = vsyncpa [#allocation4], 1 }
 0x120   :  { %163 = vsyncpa [#allocation7], 1 }
 0x121   :  { %164 = vsyncpa [#allocation5], 1 }

</bundles_post_ra>
